<compile_context>
chip_gen: v7x
topology: tpu7x:2x2x1
jax: 0.10.0
libtpu: 0.0.40
codegen_flags: <defaults>
</compile_context>

<pallas_src>
import jax
import jax.numpy as jnp
from jax.experimental import pallas as pl
from jax.experimental.pallas import tpu as pltpu
from functools import partial


def _round_up(x, m):
    return -(-x // m) * m


def _layernorm2d_kernel(x_ref, w_ref, b_ref, o_ref, *, eps):
    # Works for both block layouts:
    #   3D: x_ref (1, C, tile_s),          w/b (1, C, 1)
    #   4D: x_ref (1, C, tile_rows, 128),  w/b (1, C, 1, 1)
    # Channels sit on axis=1 in both; the reduction is over that axis.
    x = x_ref[...].astype(jnp.float32)
    mu = jnp.mean(x, axis=1, keepdims=True)
    xc = x - mu
    var = jnp.mean(xc * xc, axis=1, keepdims=True)      # biased variance (matches .pow(2).mean)
    y = xc * jax.lax.rsqrt(var + eps)                   # rsqrt -> EUP slot, free at HBM roofline
    w = w_ref[...].astype(jnp.float32)
    b = b_ref[...].astype(jnp.float32)
    o_ref[...] = (w * y + b).astype(o_ref.dtype)


def _tpu_generation():
    try:
        kind = jax.devices()[0].device_kind.lower()
    except Exception:
        return 6
    for g in (7, 6, 5, 4):
        if "v%d" % g in kind:
            return g
    return 6


def _vmem_estimate(block_elems_padded, dtype_bytes):
    # 2x double-buffered input + 2x double-buffered output blocks (input dtype)
    # + ~4 block-sized f32 temporaries (cast / centered / normalized / affine)
    # + fixed headroom for params, semaphores and compiler scratch.
    return 4 * block_elems_padded * dtype_bytes + 4 * block_elems_padded * 4 + (4 << 20)


def layernorm2d(x, weight, bias, eps=1e-6):
    """x: (N, C, H, W), weight/bias: (C,). Returns (N, C, H, W)."""
    N, C, H, W = x.shape
    S = H * W
    dtype_bytes = jnp.dtype(x.dtype).itemsize
    pack = max(1, 32 // max(1, dtype_bytes))     # sublane pack width: 8 f32 / 16 bf16 / 32 int8

    gen = _tpu_generation()
    target_bytes = (2 << 20) if gen <= 5 else (4 << 20)   # bigger blocks on v6e/v7x
    vmem_cap = (48 << 20) if gen >= 7 else (64 << 20)     # v7x has 64 MiB physical per TC
    balance_megacore = gen >= 7                           # 2 TCs per chip on v7x

    kernel = partial(_layernorm2d_kernel, eps=float(eps))
    cost = pl.CostEstimate(
        flops=int(8 * N * C * S),
        transcendentals=int(N * S),
        bytes_accessed=int(2 * N * C * S * dtype_bytes + 2 * C * dtype_bytes),
    )

    def _compiler(vmem_limit):
        return pltpu.CompilerParams(
            dimension_semantics=("parallel", "parallel"),
            vmem_limit_bytes=int(vmem_limit))

    use_4d = (C < pack) and (S % 128 == 0)

    if use_4d:
        # ---- Tiny-C path: fully sublane/lane-dense 4D blocking --------------
        R = S // 128
        if R <= pack:
            tile_rows = R                                    # full-dim rule
        else:
            row_bytes = C * 128 * dtype_bytes
            tile_rows = (target_bytes // max(1, row_bytes)) // pack * pack
            tile_rows = max(pack, min(tile_rows, _round_up(R, pack)))
            # Shrink until the padded-VMEM estimate fits the per-gen budget.
            while tile_rows > pack:
                elems_pad = C * _round_up(tile_rows, pack) * 128
                if _vmem_estimate(elems_pad, dtype_bytes) <= vmem_cap:
                    break
                new = max(pack, (tile_rows // 2) // pack * pack)
                if new == tile_rows:
                    break
                tile_rows = new
            # v7x megacore: make sure both TensorCores get at least one step.
            if balance_megacore and N * pl.cdiv(R, tile_rows) < 2 and R > pack:
                tile_rows = _round_up(pl.cdiv(R, 2), pack)

        elems_pad = C * _round_up(tile_rows, pack) * 128
        vmem_limit = min(max(_vmem_estimate(elems_pad, dtype_bytes), 24 << 20), vmem_cap)

        x4 = x.reshape(N, C, R, 128)       # free reshape, no HBM transpose
        w4 = weight.reshape(1, C, 1, 1)
        b4 = bias.reshape(1, C, 1, 1)
        grid = (N, pl.cdiv(R, tile_rows))

        out = pl.pallas_call(
            kernel,
            out_shape=jax.ShapeDtypeStruct((N, C, R, 128), x.dtype),
            grid_spec=pltpu.PrefetchScalarGridSpec(
                num_scalar_prefetch=0,
                grid=grid,
                in_specs=[
                    pl.BlockSpec((1, C, tile_rows, 128), lambda n, r: (n, 0, r, 0)),
                    pl.BlockSpec((1, C, 1, 1), lambda n, r: (0, 0, 0, 0)),
                    pl.BlockSpec((1, C, 1, 1), lambda n, r: (0, 0, 0, 0)),
                ],
                out_specs=pl.BlockSpec((1, C, tile_rows, 128), lambda n, r: (n, 0, r, 0)),
            ),
            compiler_params=_compiler(vmem_limit),
            cost_estimate=cost,
        )(x4, w4, b4)
        return out.reshape(N, C, H, W)

    # ---- General path: channels on sublanes, spatial on lanes ---------------
    # TODO(synk): optional (N, S, C) layout for the S<128 & C>=128 corner
    # (e.g. 7x7 feature maps with C=512) if that shape occurs in the workload.
    C_pad = _round_up(C, pack)
    if S < 128:
        tile_s = S                                           # full-dim rule (lane-sparse corner)
    else:
        col_bytes = C_pad * dtype_bytes                      # padded bytes per lane column
        tile_s = (target_bytes // max(1, col_bytes)) // 128 * 128
        tile_s = max(128, min(tile_s, _round_up(S, 128)))
        while tile_s > 128:
            elems_pad = C_pad * tile_s
            if _vmem_estimate(elems_pad, dtype_bytes) <= vmem_cap:
                break
            new = max(128, (tile_s // 2) // 128 * 128)
            if new == tile_s:
                break
            tile_s = new
        if balance_megacore and N * pl.cdiv(S, tile_s) < 2 and S >= 256:
            tile_s = _round_up(pl.cdiv(S, 2), 128)

    elems_pad = C_pad * _round_up(tile_s, 128)
    vmem_limit = min(max(_vmem_estimate(elems_pad, dtype_bytes), 24 << 20), vmem_cap)

    x3 = x.reshape(N, C, S)
    w3 = weight.reshape(1, C, 1)
    b3 = bias.reshape(1, C, 1)
    grid = (N, pl.cdiv(S, tile_s))

    out = pl.pallas_call(
        kernel,
        out_shape=jax.ShapeDtypeStruct((N, C, S), x.dtype),
        grid_spec=pltpu.PrefetchScalarGridSpec(
            num_scalar_prefetch=0,
            grid=grid,
            in_specs=[
                pl.BlockSpec((1, C, tile_s), lambda n, s: (n, 0, s)),
                pl.BlockSpec((1, C, 1), lambda n, s: (0, 0, 0)),
                pl.BlockSpec((1, C, 1), lambda n, s: (0, 0, 0)),
            ],
            out_specs=pl.BlockSpec((1, C, tile_s), lambda n, s: (n, 0, s)),
        ),
        compiler_params=_compiler(vmem_limit),
        cost_estimate=cost,
    )(x3, w3, b3)
    return out.reshape(N, C, H, W)


def _reference(x, weight, bias, eps=1e-6):
    # Pure-JAX replica of LayerNormFunction.forward (NCHW, normalize over C).
    mu = jnp.mean(x, axis=1, keepdims=True)
    var = jnp.mean((x - mu) ** 2, axis=1, keepdims=True)
    y = (x - mu) / jnp.sqrt(var + eps)
    return weight.reshape(1, -1, 1, 1) * y + bias.reshape(1, -1, 1, 1)


if __name__ == "__main__":
    key = jax.random.PRNGKey(0)

    # Test 1: tiny-C (4D dense) path — the module's canonical shape.
    N, C, H, W = 2, 4, 16, 16
    kx, kw, kb, kx2, kw2, kb2 = jax.random.split(key, 6)
    x = jax.random.normal(kx, (N, C, H, W), dtype=jnp.float32)
    # Module init: weight = ones(C), bias = zeros(C); perturb deterministically
    # so the affine path is actually exercised.
    weight = jnp.ones((C,), jnp.float32) + 0.1 * jax.random.normal(kw, (C,), jnp.float32)
    bias = jnp.zeros((C,), jnp.float32) + 0.1 * jax.random.normal(kb, (C,), jnp.float32)

    out = layernorm2d(x, weight, bias, eps=1e-6)
    out = jax.block_until_ready(out)
    ref = _reference(x, weight, bias, eps=1e-6)
    assert out.shape == (N, C, H, W)
    assert jnp.allclose(out, ref, atol=1e-5, rtol=1e-5), "mismatch vs reference (4D path)"

    # Test 2: general (3D) path — C at/above the sublane pack width.
    N2, C2, H2, W2 = 1, 16, 16, 16
    x2 = jax.random.normal(kx2, (N2, C2, H2, W2), dtype=jnp.float32)
    weight2 = jnp.ones((C2,), jnp.float32) + 0.1 * jax.random.normal(kw2, (C2,), jnp.float32)
    bias2 = jnp.zeros((C2,), jnp.float32) + 0.1 * jax.random.normal(kb2, (C2,), jnp.float32)

    out2 = layernorm2d(x2, weight2, bias2, eps=1e-6)
    out2 = jax.block_until_ready(out2)
    ref2 = _reference(x2, weight2, bias2, eps=1e-6)
    assert out2.shape == (N2, C2, H2, W2)
    assert jnp.allclose(out2, ref2, atol=1e-5, rtol=1e-5), "mismatch vs reference (3D path)"

    print("KERNEL_OK")
</pallas_src>

<mosaic_0001>
module attributes {stable_mosaic.version = 11 : i64} {
  func.func @_layernorm2d_kernel(%arg0: i32, %arg1: i32, %arg2: memref<1x4x2x128xf32, #tpu.memory_space<vmem>>, %arg3: memref<1x4x1x1xf32, #tpu.memory_space<vmem>>, %arg4: memref<1x4x1x1xf32, #tpu.memory_space<vmem>>, %arg5: memref<1x4x2x128xf32, #tpu.memory_space<vmem>>) attributes {dimension_semantics = [#tpu.dimension_semantics<parallel>, #tpu.dimension_semantics<parallel>], iteration_bounds = array<i64: 2, 1>, scalar_prefetch = 0 : i64, scratch_operands = 0 : i64, tpu.core_type = #tpu.core_type<tc>, window_params = [{transform_indices = @transform_0, window_bounds = array<i64: 1, 4, 2, 128>}, {pipeline_mode = #tpu.pipeline_mode<synchronous>, transform_indices = @transform_1, window_bounds = array<i64: 1, 4, 1, 1>}, {pipeline_mode = #tpu.pipeline_mode<synchronous>, transform_indices = @transform_2, window_bounds = array<i64: 1, 4, 1, 1>}, {transform_indices = @transform_3, window_bounds = array<i64: 1, 4, 2, 128>}]} {
    %c0 = arith.constant 0 : index
    %c0_0 = arith.constant 0 : index
    %c0_1 = arith.constant 0 : index
    %c0_2 = arith.constant 0 : index
    %0 = vector.load %arg2[%c0, %c0_0, %c0_1, %c0_2] : memref<1x4x2x128xf32, #tpu.memory_space<vmem>>, vector<1x4x2x128xf32>
    %cst = arith.constant dense<0.000000e+00> : vector<1x2x128xf32>
    %1 = vector.multi_reduction <add>, %0, %cst [1] : vector<1x4x2x128xf32> to vector<1x2x128xf32>
    %2 = vector.shape_cast %1 : vector<1x2x128xf32> to vector<1x1x2x128xf32>
    %cst_3 = arith.constant 4.000000e+00 : f32
    %3 = vector.broadcast %cst_3 : f32 to vector<1x1x2x128xf32>
    %4 = arith.divf %2, %3 : vector<1x1x2x128xf32>
    %5 = vector.broadcast %4 : vector<1x1x2x128xf32> to vector<1x4x2x128xf32>
    %6 = arith.subf %0, %5 : vector<1x4x2x128xf32>
    %7 = arith.mulf %6, %6 : vector<1x4x2x128xf32>
    %cst_4 = arith.constant dense<0.000000e+00> : vector<1x2x128xf32>
    %8 = vector.multi_reduction <add>, %7, %cst_4 [1] : vector<1x4x2x128xf32> to vector<1x2x128xf32>
    %9 = vector.shape_cast %8 : vector<1x2x128xf32> to vector<1x1x2x128xf32>
    %cst_5 = arith.constant 4.000000e+00 : f32
    %10 = vector.broadcast %cst_5 : f32 to vector<1x1x2x128xf32>
    %11 = arith.divf %9, %10 : vector<1x1x2x128xf32>
    %cst_6 = arith.constant 9.99999997E-7 : f32
    %12 = vector.broadcast %cst_6 : f32 to vector<1x1x2x128xf32>
    %13 = arith.addf %11, %12 : vector<1x1x2x128xf32>
    %14 = math.rsqrt %13 : vector<1x1x2x128xf32>
    %15 = vector.broadcast %14 : vector<1x1x2x128xf32> to vector<1x4x2x128xf32>
    %16 = arith.mulf %6, %15 : vector<1x4x2x128xf32>
    %c0_7 = arith.constant 0 : index
    %c0_8 = arith.constant 0 : index
    %c0_9 = arith.constant 0 : index
    %c0_10 = arith.constant 0 : index
    %17 = vector.load %arg3[%c0_7, %c0_8, %c0_9, %c0_10] : memref<1x4x1x1xf32, #tpu.memory_space<vmem>>, vector<1x4x1x1xf32>
    %c0_11 = arith.constant 0 : index
    %c0_12 = arith.constant 0 : index
    %c0_13 = arith.constant 0 : index
    %c0_14 = arith.constant 0 : index
    %18 = vector.load %arg4[%c0_11, %c0_12, %c0_13, %c0_14] : memref<1x4x1x1xf32, #tpu.memory_space<vmem>>, vector<1x4x1x1xf32>
    %19 = vector.broadcast %17 : vector<1x4x1x1xf32> to vector<1x4x2x128xf32>
    %20 = arith.mulf %19, %16 : vector<1x4x2x128xf32>
    %21 = vector.broadcast %18 : vector<1x4x1x1xf32> to vector<1x4x2x128xf32>
    %22 = arith.addf %20, %21 : vector<1x4x2x128xf32>
    %c0_15 = arith.constant 0 : index
    %c0_16 = arith.constant 0 : index
    %c0_17 = arith.constant 0 : index
    %c0_18 = arith.constant 0 : index
    %23 = vector.load %arg5[%c0_15, %c0_16, %c0_17, %c0_18] : memref<1x4x2x128xf32, #tpu.memory_space<vmem>>, vector<1x4x2x128xf32>
    tpu.vector_store %arg5[%c0_15, %c0_16, %c0_17, %c0_18], %22 {strides = array<i32>} : memref<1x4x2x128xf32, #tpu.memory_space<vmem>>, vector<1x4x2x128xf32>,
    return
  }
  func.func @transform_0(%arg0: i32, %arg1: i32) -> (i32, i32, i32, i32) {
    %c0_i32 = arith.constant 0 : i32
    %c0_i32_0 = arith.constant 0 : i32
    %c0_i32_1 = arith.constant 0 : i32
    return %arg0, %c0_i32, %arg1, %c0_i32_0 : i32, i32, i32, i32
  }
  func.func @transform_1(%arg0: i32, %arg1: i32) -> (i32, i32, i32, i32) {
    %c0_i32 = arith.constant 0 : i32
    %c0_i32_0 = arith.constant 0 : i32
    %c0_i32_1 = arith.constant 0 : i32
    %c0_i32_2 = arith.constant 0 : i32
    %c0_i32_3 = arith.constant 0 : i32
    return %c0_i32, %c0_i32_0, %c0_i32_1, %c0_i32_2 : i32, i32, i32, i32
  }
  func.func @transform_2(%arg0: i32, %arg1: i32) -> (i32, i32, i32, i32) {
    %c0_i32 = arith.constant 0 : i32
    %c0_i32_0 = arith.constant 0 : i32
    %c0_i32_1 = arith.constant 0 : i32
    %c0_i32_2 = arith.constant 0 : i32
    %c0_i32_3 = arith.constant 0 : i32
    return %c0_i32, %c0_i32_0, %c0_i32_1, %c0_i32_2 : i32, i32, i32, i32
  }
  func.func @transform_3(%arg0: i32, %arg1: i32) -> (i32, i32, i32, i32) {
    %c0_i32 = arith.constant 0 : i32
    %c0_i32_0 = arith.constant 0 : i32
    %c0_i32_1 = arith.constant 0 : i32
    return %arg0, %c0_i32, %arg1, %c0_i32_0 : i32, i32, i32, i32
  }
}

</mosaic_0001>

<bundles_post_ra>
// kernel: tpu_custom_call.1
= control target key start
LH: loop header
LB: loop body
LE: loop exit
PB: predicated region body
PF: predicated region fallthrough
CT: control target
= control target key end

     0   :  { %8 = vsyncpa [#allocation3], 0  ;;  %s882_s0 = inlined_call_operand.hbm [shape: f32[2,4,2,128], index: 0, kind: input, shape index: {}]   ;;  %s883_s1 = inlined_call_operand.vmem [shape: f32[1,4,1,1], index: 1, kind: input, shape index: {}]   ;;  %s884_s2 = inlined_call_operand.vmem [shape: f32[1,4,1,1], index: 2, kind: input, shape index: {}]   ;;  %s885_s3 = inlined_call_operand.hbm [shape: f32[2,4,2,128], index: 3, kind: output, shape index: {}]  }
   0x1   :  { %10 = vsyncpa [#allocation3 + $0x1], 0 }
   0x2   :  { %11 = vsyncpa [#allocation4], 0 }
   0x3   :  { %13 = vsyncpa [#allocation4 + $0x1], 0  ;;  %s671_s12 = smov 0   ;;  %s673_s13 = smov 0  }
   0x4   :  { %s675_s14 = smov 0   ;;  %s677_s15 = smov 0  }
   0x5   :  { %s679_s16 = smov 0   ;;  %s681_s17 = smov 0  }
   0x6 LB: > { %s434_s18 = sadd.s32 4294967295, %s642_s17   ;;  %s435_s19 = sadd.s32 4294967294, %s642_s17   ;;  %s642_s17 = sphi %s681_s17, %s19_s17   ;;  %s638_s16 = sphi %s679_s16, %s900_s16   ;;  %s634_s15 = sphi %s677_s15, %s899_s15   ;;  %s630_s14 = sphi %s675_s14, %s898_s14   ;;  %s626_s13 = sphi %s673_s13, %s897_s13   ;;  %s622_s12 = sphi %s671_s12, %s896_s12  }
   0x7   : > { %s31_s20 = sadd.s32 1, %s638_s16  ;;  %s40_s21 = sadd.s32 1, %s630_s14 }
   0x8   : > { %p33_p0 = scmp.ge.s32.totalorder %s31_s20, 2  ;;  %p47_p1 = scmp.ne.s32.totalorder %s630_s14, %s626_s13 }
   0x9   : > { %p48_p2 = scmp.eq.s32.totalorder %s642_s17, 0  ;;  %p53_p3 = scmp.ne.s32.totalorder %s626_s13, %s622_s12 }
   0xa   : > { %s902_s20 = smov (%p33_p0, %s31_s20), 0  ;;  %p54_p5 = scmp.eq.s32.totalorder %s434_s18, 0 }
   0xb   : > { %p712_p4 = por %p48_p2, %p47_p1  ;;  %s35_s23 = ssub.s32 %s638_s16, %s902_s20 }
   0xc   : > { %p121_p6 = scmp.eq.s32.totalorder %s434_s18, 1  ;;  %p38_p7 = scmp.eq.s32.totalorder %s35_s23, 0 }
   0xd   : > { %p718_p8 = por %p54_p5, %p53_p3  ;;  %p127_p10 = scmp.eq.s32.totalorder %s435_s19, 1 }
   0xe   : > { %p722_p9 = por %p121_p6, %p47_p1  ;;  %p471_p13 = scmp.lt.s32.totalorder %s642_s17, 2 }
   0xf   : > { %s727_s26 = scalar_select %p38_p7, %s630_s14, %s40_s21  }
  0x10   : > { %s889_s25 = scalar_select %p722_p9, 1, 0 }
  0x11   : > { %p729_p11 = por %p127_p10, %p53_p3  ;;  %s153_s28 = sand.u32 1, %s630_s14  }
  0x12   : > { %s438_s29 = sshll.u32 %s153_s28, 3  ;;  %s457_s30 = sshll.u32 %s638_s16, 7 }
  0x13   : > { %s890_s27 = scalar_select %p729_p11, 1, 0 }
  0x14   : > { %s740_s6 = scalar_lea.hbm %s882_s0, %s457_s30  ;;  %s157_s7 = scalar_lea.vmem [#allocation2], %s438_s29 }
  0x15   : > { %s165_s8 = sshll.u32 %s157_s7, 4  ;;  %p746_p0 = pnand %p471_p13, %p712_p4  ;;  %s742_s8 = int_to_ptr.vmem [resolvable:$true] %s165_s8 }
  0x16   : > { %s751_s10 = scalar_lea.sflag [#allocation3], %s153_s28  ;;  %s530_s11 = scalar_lea.hbm %s740_s6, 128 }
  0x17   : > { %p531_p2 = scmp.ne.s32.totalorder %s740_s6, %s530_s11  ;;  %p532_p3 = pneg %p746_p0 }
  0x18   : > { %s535_s21 = scalar_lea.hbm %s882_s0, 256  ;;  %p536_p4 = scmp.lt.u32.totalorder %s740_s6, %s882_s0 }
  0x19   : > { %p533_p5 = pnand %p532_p3, %p531_p2  ;;  %p537_p7 = scmp.lt.u32.totalorder %s535_s21, %s530_s11 }
  0x1a   : > { %p539_p13 = scmp.lt.u32.totalorder %s530_s11, %s740_s6 }
  0x1b   : > { %p534_p6 = pneg %p533_p5  ;;  %p538_p10 = por %p537_p7, %p536_p4 }
  0x1d   : > { %p540_p12 = por %p539_p13, %p538_p10 }
  0x1f   : > { %p541_p1 = pnand %p540_p12, %p534_p6 }
  0x21   : > { %544 = shalt.err (!%p541_p1)
}
  0x22   : > { %s545_s28 = scalar_lea.vmem %s742_s8, 128  ;;  %s644_s29 = smov [#allocation2]  }
  0x23   : > { %p546_p2 = scmp.ne.s32.totalorder %s742_s8, %s545_s28  ;;  %s550_s30 = sshll.u32 %s644_s29, 4  ;;  %s551_s30 = int_to_ptr.vmem [resolvable:$false] %s550_s30 }
  0x24   : > { %s552_s4 = scalar_lea.vmem %s551_s30, 256  ;;  %p553_p9 = scmp.lt.s32.totalorder %s742_s8, %s551_s30 }
  0x25   : > { %p548_p5 = pnand %p546_p2, %p532_p3  ;;  %p554_p4 = scmp.lt.s32.totalorder %s552_s4, %s545_s28 }
  0x27   : > { %p549_p11 = pneg %p548_p5  ;;  %p555_p7 = por %p554_p4, %p553_p9 }
  0x29   : > { %p556_p10 = pnand %p555_p7, %p549_p11 }
  0x2b   : > { %559 = shalt.err (!%p556_p10)
}
  0x2c   : > { %s645_s5 = smov 32   ;;  %s646_s7 = smov 2  }
  0x2d   : > { %466 = dma.hbm_to_vmem [thread:$0]  (!%p746_p0), %s740_s6, 128, %s742_s8, %s751_s10, %s645_s5, %s645_s5, %s646_s7  }
  0x2e   : > { %p173_p12 = scmp.lt.s32.totalorder %s642_s17, 3  ;;  %p892_p1 = scmp.ge.s32.totalorder %s642_s17, 1 }
  0x30   : > { %p174_p3 = pnand %p892_p1, %p173_p12 }
  0x31   : > { %s783_s11 = sand.u32 (!%p174_p3), 1, %s626_s13  }
  0x32   : > { %177 = sbr.rel (%p174_p3) target bundleno = 217 (0xd9), region = 32  ;;  %s442_s18 = sshll.u32 (!%p174_p3), %s783_s11, 3 }
  0x33   : > { %s180_s19 = scalar_lea.sflag (!%p174_p3), [#allocation3], %s783_s11  ;;  %s183_s21 = scalar_lea.vmem (!%p174_p3), [#allocation2], %s442_s18 }
  0x39   : > { %613 = dma.done.wait (%p718_p8), %s180_s19, 128  }
  0x3a   : > { %615 = vsyncadd (%p718_p8), %s180_s19, 4294967168  ;;  %v647_v0 = vmov 0   ;;  %v446_v1 = vld [vmem:[%s883_s1 + $0x2] ss:$0 sm:$0xff]  ;;  %v444_v2 = vld [vmem:[%s883_s1] ss:$0 sm:$0xff] }
  0x3b   : > { %527 = vset.pattern.permute.xlu1 %v647_v0  ;;  %526 = vset.pattern.permute.xlu0 %v647_v0  ;;  %v447_v3 = vld [vmem:[%s883_s1 + $0x3] ss:$0 sm:$0xff]  ;;  %v445_v4 = vld [vmem:[%s883_s1 + $0x1] ss:$0 sm:$0xff]  ;;  %v448_v6 = vld [vmem:[%s884_s2] ss:$0 sm:$0xff] }
  0x3c   : > { %279 = vperm.xlu1 %527, %v446_v1   ;;  %271 = vperm.xlu0 %526, %v444_v2   ;;  %v449_v5 = vld [vmem:[%s884_s2 + $0x1] ss:$0 sm:$0xff]  ;;  %v451_v7 = vld [vmem:[%s884_s2 + $0x3] ss:$0 sm:$0xff]  ;;  %v450_v8 = vld [vmem:[%s884_s2 + $0x2] ss:$0 sm:$0xff] }
  0x3d   : > { %vm210_vm0 = vcmask 1041408   ;;  %v206_v9 = vld [vmem:[%s183_s21] sm:$0x3]  ;;  %v207_v10 = vld [vmem:[%s183_s21 + $0x2] sm:$0x3]  ;;  %s458_s10 = sshll.u32 %s634_s15, 7 }
  0x3e   : > { %v211_v11 = vsel %vm210_vm0, %v206_v9, 0.0  ;;  %v212_v12 = vsel %vm210_vm0, %v207_v10, 0.0  ;;  %v208_v13 = vld [vmem:[%s183_s21 + $0x4] sm:$0x3]  ;;  %v209_v16 = vld [vmem:[%s183_s21 + $0x6] sm:$0x3]  ;;  %s833_s23 = scalar_lea.hbm %s885_s3, %s458_s10 }
  0x3f   : > { %v213_v14 = vadd.f32 %v212_v12, %v211_v11  ;;  %v214_v15 = vsel %vm210_vm0, %v208_v13, 0.0  ;;  %v216_v18 = vsel %vm210_vm0, %v209_v16, 0.0  ;;  %s205_s21 = scalar_lea.vmem [#allocation5], %s442_s18  ;;  %s335_s15 = scalar_lea.sflag [#allocation4], %s783_s11 }
  0x40   : > { %283 = vperm.xlu1 %527, %v447_v3   ;;  %275 = vperm.xlu0 %526, %v445_v4   ;;  %s349_s9 = sshll.u32 %s205_s21, 4  ;;  %p893_p9 = scmp.ne.s32.totalorder %s889_s25, 0  ;;  %s828_s9 = int_to_ptr.vmem [resolvable:$true] %s349_s9 }
  0x41   : > { %v215_v17 = vadd.f32 %v214_v15, %v213_v14  ;;  %s560_s28 = scalar_lea.vmem %s828_s9, 128  ;;  %s648_s24 = smov [#allocation5]  }
  0x42   : > { %p561_p8 = scmp.ne.s32.totalorder %s828_s9, %s560_s28  ;;  %s564_s29 = sshll.u32 %s648_s24, 4  ;;  %s565_s29 = int_to_ptr.vmem [resolvable:$false] %s564_s29 }
  0x43   : > { %v217_v19 = vadd.f32 %v216_v18, %v215_v17  ;;  %s566_s30 = scalar_lea.vmem %s565_s29, 256  ;;  %p567_p6 = scmp.lt.s32.totalorder %s828_s9, %s565_s29 }
  0x44   : > { %315 = vperm.xlu1 %527, %v449_v5   ;;  %311 = vperm.xlu0 %526, %v448_v6   ;;  %p562_p11 = pnand %p561_p8, %p893_p9  ;;  %p568_p13 = scmp.lt.s32.totalorder %s566_s30, %s560_s28 }
  0x45   : > { %v219_v20 = vmul.f32 0.25, %v217_v19 }
  0x46   : > { %p563_p0 = pneg %p562_p11  ;;  %p569_p2 = por %p568_p13, %p567_p6 }
  0x47   : > { %v220_v21 = vsub.f32 %v206_v9, %v219_v20  ;;  %v221_v22 = vsub.f32 %v207_v10, %v219_v20  ;;  %v222_v23 = vsub.f32 %v208_v13, %v219_v20  ;;  %v223_v26 = vsub.f32 %v209_v16, %v219_v20 }
  0x48   : > { %323 = vperm.xlu1 %527, %v451_v7   ;;  %319 = vperm.xlu0 %526, %v450_v8   ;;  %p570_p5 = pnand %p569_p2, %p563_p0 }
  0x49   : > { %v224_v24 = vmul.f32 %v220_v21, %v220_v21  ;;  %v225_v25 = vmul.f32 %v221_v22, %v221_v22  ;;  %v226_v27 = vmul.f32 %v222_v23, %v222_v23  ;;  %v227_v31 = vmul.f32 %v223_v26, %v223_v26 }
  0x4b   : > { %v228_v28 = vsel %vm210_vm0, %v224_v24, 0.0  ;;  %v229_v29 = vsel %vm210_vm0, %v225_v25, 0.0  ;;  %v231_v32 = vsel %vm210_vm0, %v226_v27, 0.0  ;;  %v233_v34 = vsel %vm210_vm0, %v227_v31, 0.0 }
  0x4c   : > { %v230_v30 = vadd.f32 %v229_v29, %v228_v28 }
  0x4e   : > { %v232_v33 = vadd.f32 %v231_v32, %v230_v30 }
  0x50   : > { %v234_v35 = vadd.f32 %v233_v34, %v232_v33 }
  0x52   : > { %v235_v36 = vmul.f32 0.25, %v234_v35 }
  0x54   : > { %v236_v37 = vadd.f32 1e-06, %v235_v36 }
  0x56   : > { %528 = vrsqrt.f32 %v236_v37 }
  0x60   : > { %v529_v38 = vpop.eup %528 }
  0x61   : > { %v238_v41 = vmul.f32 %v529_v38, %v220_v21  ;;  %v239_v42 = vmul.f32 %v529_v38, %v221_v22  ;;  %v240_v45 = vmul.f32 %v529_v38, %v222_v23  ;;  %v241_v47 = vmul.f32 %v529_v38, %v223_v26 }
  0xbb   : > { %v280_v39 = vpop.permute.xlu1 %279  ;;  %v272_v40 = vpop.permute.xlu0 %271 }
  0xbc   : > { %v286_v46 = vmul.f32 %v272_v40, %v238_v41  ;;  %v288_v53 = vmul.f32 %v280_v39, %v240_v45 }
  0xbf   : > { %v284_v43 = vpop.permute.xlu1 %283  ;;  %v276_v44 = vpop.permute.xlu0 %275 }
  0xc0   : > { %v287_v48 = vmul.f32 %v276_v44, %v239_v42  ;;  %v289_v54 = vmul.f32 %v284_v43, %v241_v47 }
  0xc3   : > { %v316_v49 = vpop.permute.xlu1 %315  ;;  %v312_v50 = vpop.permute.xlu0 %311 }
  0xc4   : > { %v327_v51 = vadd.f32 %v316_v49, %v287_v48  ;;  %v326_v52 = vadd.f32 %v312_v50, %v286_v46 }
  0xc6   : > { %331 = vst [vmem:[%s205_s21 + $0x2] sm:$0x3] %v327_v51  ;;  %330 = vst [vmem:[%s205_s21] sm:$0x3] %v326_v52 }
  0xc7   : > { %v324_v55 = vpop.permute.xlu1 %323  ;;  %v320_v56 = vpop.permute.xlu0 %319 }
  0xc8   : > { %v329_v57 = vadd.f32 %v324_v55, %v289_v54  ;;  %v328_v58 = vadd.f32 %v320_v56, %v288_v53 }
  0xca   : > { %333 = vst [vmem:[%s205_s21 + $0x6] sm:$0x3] %v329_v57  ;;  %332 = vst [vmem:[%s205_s21 + $0x4] sm:$0x3] %v328_v58 }
  0xcb   : > { %573 = shalt.err (!%p570_p5)
}
  0xcc   : > { %s574_s4 = scalar_lea.hbm %s833_s23, 128  ;;  %s578_s19 = scalar_lea.hbm %s885_s3, 256 }
  0xcd   : > { %p575_p4 = scmp.ne.s32.totalorder %s833_s23, %s574_s4  ;;  %p579_p12 = scmp.lt.u32.totalorder %s833_s23, %s885_s3 }
  0xce   : > { %p580_p1 = scmp.lt.u32.totalorder %s578_s19, %s574_s4  ;;  %p582_p8 = scmp.lt.u32.totalorder %s574_s4, %s833_s23 }
  0xcf   : > { %p576_p7 = pnand %p575_p4, %p893_p9 }
  0xd0   : > { %p581_p3 = por %p580_p1, %p579_p12 }
  0xd1   : > { %p577_p10 = pneg %p576_p7 }
  0xd2   : > { %p583_p11 = por %p582_p8, %p581_p3 }
  0xd4   : > { %p584_p0 = pnand %p583_p11, %p577_p10 }
  0xd6   : > { %587 = shalt.err (!%p584_p0)
}
  0xd7   : > { %s649_s21 = smov 32   ;;  %s650_s10 = smov 2  }
  0xd8   : > { %461 = dma.vmem_to_hbm [thread:$0]  (%p893_p9), %s828_s9, 128, %s833_s23, %s335_s15, %s649_s21, %s649_s21, %s650_s10  }
  0xd9 PF: > { %s364_s18 = sand.u32 1, %s622_s12   ;;  %p894_p6 = scmp.ne.s32.totalorder %s890_s27, 0 }
  0xda   : > { %p895_p13 = scmp.ge.s32.totalorder %s642_s17, 2  ;;  %s365_s22 = scalar_lea.sflag [#allocation4], %s364_s18 }
  0xdc   : > { %p468_p2 = pnand %p895_p13, %p894_p6 }
  0xde   : > { %617 = dma.done.wait (!%p468_p2), %s365_s22, 128  }
  0xdf   : > { %619 = vsyncadd (!%p468_p2), %s365_s22, 4294967168  ;;  %s19_s17 = sadd.s32 1, %s642_s17   ;;  %s896_s12 = smov %s626_s13 }
  0xe0   : > { %p16_p5 = scmp.ge.s32.totalorder %s19_s17, 4   ;;  %s897_s13 = smov %s630_s14 }
  0xe1   : > { %s898_s14 = smov %s727_s26  ;;  %s899_s15 = smov %s638_s16 }
  0xe2   : > { %s900_s16 = smov %s902_s20  ;;  %18 = sbr.rel (!%p16_p5) target bundleno = 6 (0x6), region = 77 }
  0xe9   :  { %370 = vsyncpa [#allocation3], 1 }
  0xea   :  { %372 = vsyncpa [#allocation3 + $0x1], 1 }
  0xeb   :  { %373 = vsyncpa [#allocation4], 1 }
  0xec   :  { %375 = vsyncpa [#allocation4 + $0x1], 1 }

</bundles_post_ra>
